<compile_context>
chip_gen: v7x
topology: tpu7x:2x2x1
jax: 0.10.0
libtpu: 0.0.40
codegen_flags: <defaults>
</compile_context>

<pallas_src>
import jax
import jax.numpy as jnp
from jax.experimental import pallas as pl
from jax.experimental.pallas import tpu as pltpu


def _round_up(a, m):
    return ((a + m - 1) // m) * m


def _tile_candidates(padded_dim, align):
    """Multiples of `align` that evenly divide `padded_dim`, ascending."""
    return [d for d in range(align, padded_dim + 1, align) if padded_dim % d == 0]


def _pick_tile(padded_dim, align, cap):
    cands = _tile_candidates(padded_dim, align)
    best = cands[0]
    for c in cands:
        if c <= cap:
            best = c
    return best, cands


# ----------------------------------------------------------------------------
# Kernels
# ----------------------------------------------------------------------------
def _linear_kernel_f32out(x_ref, wt_ref, b_ref, o_ref):
    """float32 output: accumulate directly into the resident output block."""
    k = pl.program_id(2)

    @pl.when(k == 0)
    def _():
        # Bias added exactly once, in f32.
        o_ref[...] = jnp.broadcast_to(b_ref[...].astype(jnp.float32), o_ref.shape)

    o_ref[...] += jnp.dot(x_ref[...], wt_ref[...],
                          preferred_element_type=jnp.float32)


def _linear_kernel_acc(x_ref, wt_ref, b_ref, o_ref, acc_ref):
    """Generic output dtype: f32 VMEM accumulator, cast at the last K step."""
    k = pl.program_id(2)

    @pl.when(k == 0)
    def _():
        acc_ref[...] = jnp.broadcast_to(b_ref[...].astype(jnp.float32),
                                        acc_ref.shape)

    acc_ref[...] += jnp.dot(x_ref[...], wt_ref[...],
                            preferred_element_type=jnp.float32)

    @pl.when(k == pl.num_programs(2) - 1)
    def _():
        o_ref[...] = acc_ref[...].astype(o_ref.dtype)


# ----------------------------------------------------------------------------
# One-time parameter prep (NOT in the per-call path)
# ----------------------------------------------------------------------------
def prepare_params(w, b, *, param_dtype=jnp.bfloat16):
    """PyTorch layout w:(N, K), b:(1, N)  ->  kernel layout.

    Returns:
      w_t : (Kp, Np) weight, transposed, cast to `param_dtype`, padded so that
            Kp, Np are multiples of 128 (lane-dense tiles, no masked stores).
      b_p : (1, Np) bias kept in float32 (accumulation dtype), zero-padded.
      n_out : logical output dim (to slice padding off the result).
    """
    w = jnp.asarray(w)
    b = jnp.asarray(b)
    N, K = w.shape
    Kp, Np = _round_up(K, 128), _round_up(N, 128)
    w_t = jnp.pad(w.T.astype(param_dtype), ((0, Kp - K), (0, Np - N)))
    b_p = jnp.pad(jnp.reshape(b, (1, N)).astype(jnp.float32),
                  ((0, 0), (0, Np - N)))
    return w_t, b_p, N


# ----------------------------------------------------------------------------
# Forward
# ----------------------------------------------------------------------------
def linear_forward(x, w_t, b, n_out, *, compute_dtype=jnp.bfloat16,
                   out_dtype=None, tm_cap=512, tn_cap=512, tk_cap=None):
    """Compute x @ w_t + b (w_t / b from `prepare_params`) on the MXU.

    x   : (B, K)
    w_t : (Kp, Np)  pre-transposed / pre-cast / pre-padded weight
    b   : (1, Np)   float32 bias, pre-padded
    n_out : logical N
    returns (B, n_out) in `out_dtype` (defaults to x.dtype).
    """
    B, K = x.shape
    Kp, Np = w_t.shape
    assert Kp == _round_up(K, 128), "weight K dim does not match input"
    assert b.shape == (1, Np), "bias shape mismatch"
    assert n_out <= Np

    out_dtype = out_dtype or x.dtype
    if compute_dtype is not None and x.dtype != compute_dtype:
        x = x.astype(compute_dtype)

    x_bytes = jnp.dtype(x.dtype).itemsize
    w_bytes = jnp.dtype(w_t.dtype).itemsize
    out_bytes = jnp.dtype(out_dtype).itemsize
    if tk_cap is None:
        # Bigger K tiles amortize the per-step acc read-modify-write and the
        # ~0.35us grid-step overhead; bf16 operands allow 2x the K depth.
        tk_cap = 2048 if max(x_bytes, w_bytes) <= 2 else 1024

    # ---- tile selection -----------------------------------------------------
    Mp8 = _round_up(B, 8)
    if Mp8 <= tm_cap:
        tm, Mp = Mp8, Mp8                      # single M block, minimal padding
    else:
        tm = tm_cap
        Mp = _round_up(B, tm)
    tn, tn_cands = _pick_tile(Np, 128, tn_cap)  # divides Np -> no extra N pad
    tk, tk_cands = _pick_tile(Kp, 128, tk_cap)  # divides Kp -> no extra K pad

    use_scratch = jnp.dtype(out_dtype) != jnp.dtype(jnp.float32)

    def footprint(tm_, tn_, tk_):
        f = 2 * (tm_ * tk_ * x_bytes + tk_ * tn_ * w_bytes)  # dbl-buffered in
        f += 2 * tn_ * 4                                      # bias
        f += 2 * tm_ * tn_ * out_bytes                        # dbl-buffered out
        if use_scratch:
            f += tm_ * tn_ * 4                                # f32 accumulator
        return f

    # 48 MiB budget fits v7x (64 MiB / TC) as well as v5e / v6e (128 MiB).
    budget = 48 * 1024 * 1024
    while footprint(tm, tn, tk) > budget:
        smaller_k = [c for c in tk_cands if c < tk]
        smaller_n = [c for c in tn_cands if c < tn]
        if smaller_k:                      # extra K steps are the cheapest cut
            tk = smaller_k[-1]
        elif smaller_n:
            tn = smaller_n[-1]
        elif tm > 8:
            new_tm = max(8, _round_up(tm // 2, 8))
            if new_tm >= tm:
                break
            tm = new_tm
            Mp = _round_up(B, tm)
        else:
            break

    # Megacore (v7x has 2 TensorCores): make sure the parallel part of the grid
    # has at least 2 blocks when the problem allows it.
    if (Mp // tm) * (Np // tn) < 2:
        smaller_n = [c for c in tn_cands if c < tn]
        if smaller_n:
            tn = smaller_n[-1]
        elif tm >= 16 and tm % 16 == 0:
            tm //= 2                       # Mp == old tm, still divisible

    grid = (Mp // tm, Np // tn, Kp // tk)

    # Zero-pad x only when actually needed (ragged B or non-128-aligned K).
    if (Mp, Kp) != (B, K):
        x = jnp.pad(x, ((0, Mp - B), (0, Kp - K)))

    vmem_limit = int(min(max(footprint(tm, tn, tk) + (4 << 20), 16 << 20),
                         48 << 20))

    cost = pl.CostEstimate(
        flops=2 * Mp * Np * Kp,
        transcendentals=0,
        bytes_accessed=(Mp * Kp * x_bytes + Kp * Np * w_bytes
                        + Np * 4 + Mp * Np * out_bytes),
    )

    kernel = _linear_kernel_acc if use_scratch else _linear_kernel_f32out
    scratch = [pltpu.VMEM((tm, tn), jnp.float32)] if use_scratch else []

    out_padded = pl.pallas_call(
        kernel,
        out_shape=jax.ShapeDtypeStruct((Mp, Np), out_dtype),
        grid_spec=pltpu.PrefetchScalarGridSpec(
            num_scalar_prefetch=0,
            grid=grid,
            in_specs=[
                pl.BlockSpec((tm, tk), lambda i, j, k: (i, k)),
                pl.BlockSpec((tk, tn), lambda i, j, k: (k, j)),
                pl.BlockSpec((1, tn), lambda i, j, k: (0, j)),
            ],
            out_specs=pl.BlockSpec((tm, tn), lambda i, j, k: (i, j)),
            scratch_shapes=scratch,
        ),
        compiler_params=pltpu.CompilerParams(
            dimension_semantics=("parallel", "parallel", "arbitrary"),
            vmem_limit_bytes=vmem_limit,
        ),
        cost_estimate=cost,
    )(x, w_t, b)

    if (Mp, Np) != (B, n_out):
        out_padded = out_padded[:B, :n_out]
    return out_padded


if __name__ == "__main__":
    key = jax.random.PRNGKey(0)
    k_x, k_w, k_b = jax.random.split(key, 3)

    batch = 8
    input_dim = 32
    output_dim = 16

    # Deterministic "normal_()"-style parameter init (synthetic, not a checkpoint).
    x = jax.random.normal(k_x, (batch, input_dim), dtype=jnp.float32)
    w = jax.random.normal(k_w, (output_dim, input_dim), dtype=jnp.float32)  # (out, in)
    b = jax.random.normal(k_b, (1, output_dim), dtype=jnp.float32)

    ref = x @ w.T + b

    # Default fast path: bf16 operands on the MXU, f32 accumulation, f32 output.
    w_t_bf16, b_p, n_out = prepare_params(w, b)                  # one-time prep
    out_bf16 = jax.block_until_ready(linear_forward(x, w_t_bf16, b_p, n_out))
    assert out_bf16.shape == (batch, output_dim)
    assert out_bf16.dtype == jnp.float32
    assert jnp.allclose(out_bf16, ref, atol=2.5e-1, rtol=5e-2), "bf16 path mismatch"

    # Exact float32 path for reference-level verification.
    w_t_f32, b_p32, _ = prepare_params(w, b, param_dtype=jnp.float32)
    out_f32 = jax.block_until_ready(
        linear_forward(x, w_t_f32, b_p32, n_out, compute_dtype=jnp.float32))
    assert jnp.allclose(out_f32, ref, atol=1e-5, rtol=1e-5), "f32 path mismatch"

    print("KERNEL_OK")
</pallas_src>

<mosaic_0001>
module attributes {stable_mosaic.version = 11 : i64} {
  func.func @_linear_kernel_f32out(%arg0: i32, %arg1: i32, %arg2: i32, %arg3: memref<8x128xbf16, #tpu.memory_space<vmem>>, %arg4: memref<128x128xbf16, #tpu.memory_space<vmem>>, %arg5: memref<1x128xf32, #tpu.memory_space<vmem>>, %arg6: memref<8x128xf32, #tpu.memory_space<vmem>>) attributes {dimension_semantics = [#tpu.dimension_semantics<parallel>, #tpu.dimension_semantics<parallel>, #tpu.dimension_semantics<arbitrary>], iteration_bounds = array<i64: 1, 1, 1>, scalar_prefetch = 0 : i64, scratch_operands = 0 : i64, tpu.core_type = #tpu.core_type<tc>, window_params = [{transform_indices = @transform_0, window_bounds = array<i64: 8, 128>}, {transform_indices = @transform_1, window_bounds = array<i64: 128, 128>}, {transform_indices = @transform_2, window_bounds = array<i64: 1, 128>}, {transform_indices = @transform_3, window_bounds = array<i64: 8, 128>}]} {
    %c0_i32 = arith.constant 0 : i32
    %0 = arith.cmpi eq, %arg2, %c0_i32 : i32
    %1 = arith.extui %0 : i1 to i32
    %c0_i32_0 = arith.constant 0 : i32
    %2 = arith.cmpi ne, %1, %c0_i32_0 : i32
    scf.if %2 {
      %c0_8 = arith.constant 0 : index
      %c0_9 = arith.constant 0 : index
      %9 = vector.load %arg5[%c0_8, %c0_9] : memref<1x128xf32, #tpu.memory_space<vmem>>, vector<1x128xf32>
      %10 = vector.shape_cast %9 : vector<1x128xf32> to vector<1x128xf32>
      %11 = vector.broadcast %10 : vector<1x128xf32> to vector<8x128xf32>
      %c0_10 = arith.constant 0 : index
      %c0_11 = arith.constant 0 : index
      %12 = vector.load %arg6[%c0_10, %c0_11] : memref<8x128xf32, #tpu.memory_space<vmem>>, vector<8x128xf32>
      tpu.vector_store %arg6[%c0_10, %c0_11], %11 {strides = array<i32>} : memref<8x128xf32, #tpu.memory_space<vmem>>, vector<8x128xf32>,
    } else {
    }
    %c0 = arith.constant 0 : index
    %c0_1 = arith.constant 0 : index
    %3 = vector.load %arg6[%c0, %c0_1] : memref<8x128xf32, #tpu.memory_space<vmem>>, vector<8x128xf32>
    %c0_2 = arith.constant 0 : index
    %c0_3 = arith.constant 0 : index
    %4 = vector.load %arg3[%c0_2, %c0_3] : memref<8x128xbf16, #tpu.memory_space<vmem>>, vector<8x128xbf16>
    %c0_4 = arith.constant 0 : index
    %c0_5 = arith.constant 0 : index
    %5 = vector.load %arg4[%c0_4, %c0_5] : memref<128x128xbf16, #tpu.memory_space<vmem>>, vector<128x128xbf16>
    %cst = arith.constant dense<0.000000e+00> : vector<8x128xf32>
    %6 = tpu.matmul %4, %5, %cst {dimension_numbers = #tpu.dot_dimension_numbers<[1], [0], [0], [1], [0, 0, 1, 1], [], []>} : vector<8x128xbf16>, vector<128x128xbf16>, vector<8x128xf32> -> vector<8x128xf32>
    %7 = arith.addf %3, %6 : vector<8x128xf32>
    %c0_6 = arith.constant 0 : index
    %c0_7 = arith.constant 0 : index
    %8 = vector.load %arg6[%c0_6, %c0_7] : memref<8x128xf32, #tpu.memory_space<vmem>>, vector<8x128xf32>
    tpu.vector_store %arg6[%c0_6, %c0_7], %7 {strides = array<i32>} : memref<8x128xf32, #tpu.memory_space<vmem>>, vector<8x128xf32>,
    return
  }
  func.func @transform_0(%arg0: i32, %arg1: i32, %arg2: i32) -> (i32, i32) {
    %c0_i32 = arith.constant 0 : i32
    return %arg0, %arg2 : i32, i32
  }
  func.func @transform_1(%arg0: i32, %arg1: i32, %arg2: i32) -> (i32, i32) {
    %c0_i32 = arith.constant 0 : i32
    return %arg2, %arg1 : i32, i32
  }
  func.func @transform_2(%arg0: i32, %arg1: i32, %arg2: i32) -> (i32, i32) {
    %c0_i32 = arith.constant 0 : i32
    %c0_i32_0 = arith.constant 0 : i32
    return %c0_i32, %arg1 : i32, i32
  }
  func.func @transform_3(%arg0: i32, %arg1: i32, %arg2: i32) -> (i32, i32) {
    %c0_i32 = arith.constant 0 : i32
    return %arg0, %arg1 : i32, i32
  }
}

</mosaic_0001>

<bundles_post_ra>
// kernel: tpu_custom_call.1
= control target key start
LH: loop header
LB: loop body
LE: loop exit
PB: predicated region body
PF: predicated region fallthrough
CT: control target
= control target key end

     0   :  { %8 = vsyncpa [#allocation3], 0  ;;  %s376_s0 = inlined_call_operand.hbm [shape: bf16[8,128], index: 0, kind: input, shape index: {}]   ;;  %s377_s1 = inlined_call_operand.hbm [shape: bf16[128,128], index: 1, kind: input, shape index: {}]   ;;  %s378_s2 = inlined_call_operand.vmem [shape: f32[1,128], index: 2, kind: input, shape index: {}]   ;;  %s379_s3 = inlined_call_operand.hbm [shape: f32[8,128], index: 3, kind: output, shape index: {}]  }
   0x1   :  { %9 = vsyncpa [#allocation6], 0 }
   0x2   :  { %10 = vsyncpa [#allocation4], 0  ;;  %s303_s12 = smov [#allocation2]   ;;  %s304_s14 = smov [#allocation5]  }
   0x3   :  { %s17_s13 = sshll.u32 %s303_s12, 4  ;;  %s26_s15 = sshll.u32 %s304_s14, 4  ;;  %s18_s13 = int_to_ptr.vmem [resolvable:$true] %s17_s13  ;;  %s330_s15 = int_to_ptr.vmem [resolvable:$true] %s26_s15 }
   0x4   :  { %s231_s18 = scalar_lea.hbm %s376_s0, 64 }
   0x5   :  { %p232_p0 = scmp.ne.s32.totalorder %s376_s0, %s231_s18  ;;  %p235_p1 = scmp.lt.u32.totalorder %s231_s18, %s376_s0 }
   0x7   :  { %p237_p2 = pnand %p235_p1, %p232_p0 }
   0x9   :  { %240 = shalt.err (!%p237_p2)
}
   0xa   :  { %s241_s23 = scalar_lea.vmem %s18_s13, 64  ;;  %p246_p4 = scmp.lt.s32.totalorder %s18_s13, %s18_s13 }
   0xb   :  { %p242_p3 = scmp.ne.s32.totalorder %s18_s13, %s241_s23  ;;  %p247_p5 = scmp.lt.s32.totalorder %s241_s23, %s241_s23 }
   0xd   :  { %p248_p6 = por %p247_p5, %p246_p4 }
   0xf   :  { %p249_p7 = pnand %p248_p6, %p242_p3 }
  0x11   :  { %252 = shalt.err (!%p249_p7)
}
  0x12   :  { %20 = dma.hbm_to_vmem [thread:$0]  %s376_s0, 64, %s18_s13, [#allocation3]  }
  0x13   :  { %s253_s28 = scalar_lea.hbm %s377_s1, 1024 }
  0x14   :  { %p254_p8 = scmp.ne.s32.totalorder %s377_s1, %s253_s28  ;;  %p257_p9 = scmp.lt.u32.totalorder %s253_s28, %s377_s1 }
  0x16   :  { %p259_p10 = pnand %p257_p9, %p254_p8 }
  0x18   :  { %262 = shalt.err (!%p259_p10)
}
  0x19   :  { %s263_s6 = scalar_lea.vmem %s330_s15, 1024  ;;  %p268_p12 = scmp.lt.s32.totalorder %s330_s15, %s330_s15 }
  0x1a   :  { %p264_p11 = scmp.ne.s32.totalorder %s330_s15, %s263_s6  ;;  %p269_p13 = scmp.lt.s32.totalorder %s263_s6, %s263_s6 }
  0x1c   :  { %p270_p0 = por %p269_p13, %p268_p12 }
  0x1e   :  { %p271_p1 = pnand %p270_p0, %p264_p11 }
  0x20   :  { %274 = shalt.err (!%p271_p1)
}
  0x21   :  { %s305_s0 = smov 64   ;;  %s306_s7 = smov 4  }
  0x22   :  { %32 = dma.hbm_to_vmem [thread:$0]  %s377_s1, 1024, %s330_s15, [#allocation6], %s305_s0, %s305_s0, %s306_s7  }
  0x23   :  { %297 = dma.done.wait [#allocation3], 64  }
  0x24   :  { %298 = vsyncadd [#allocation3], 4294967232 }
  0x25   :  { %299 = dma.done.wait [#allocation6], 1024  }
  0x26   :  { %300 = vsyncadd [#allocation6], 4294966272  ;;  %v307_v0 = vmov 0.0   ;;  %vm308_vm0 = vmmov 0   ;;  %v223_v1 = vld [vmem:[#allocation5] sm:$0xff]   ;;  %v224_v2 = vld [vmem:[#allocation5 + $0x8] sm:$0xff]  }
  0x27   :  { %196 = vmatprep.subr.bf16.mxu0 %v307_v0  ;;  %212 = vmatprep.mubr.msk.bf16.mxu0 %vm308_vm0, %v307_v0  ;;  %v225_v3 = vld [vmem:[#allocation5 + $0x10] sm:$0xff]   ;;  %v226_v4 = vld [vmem:[#allocation5 + $0x18] sm:$0xff]   ;;  %v227_v5 = vld [vmem:[#allocation5 + $0x20] sm:$0xff]   ;;  %s309_s11 = smov [#allocation7]  }
  0x28   :  { %197 = vmatpush3.bf16.msra.mxu0 %v223_v1  ;;  %v228_v6 = vld [vmem:[#allocation5 + $0x28] sm:$0xff]   ;;  %v229_v7 = vld [vmem:[#allocation5 + $0x30] sm:$0xff]   ;;  %v230_v8 = vld [vmem:[#allocation5 + $0x38] sm:$0xff]   ;;  %s168_s12 = sshll.u32 %s309_s11, 4  ;;  %s169_s12 = int_to_ptr.vmem [resolvable:$true] %s168_s12 }
  0x29   :  { %198 = vmatprep.subr.bf16.mxu0 %v307_v0  ;;  %v55_v9 = vld [vmem:[#allocation2] sm:$0xf]  ;;  %s275_s13 = scalar_lea.vmem %s169_s12, 128  ;;  %p280_p3 = scmp.lt.s32.totalorder %s169_s12, %s169_s12 }
  0x2a   :  { %v178_v10 = vld [vmem:[%s378_s2] ss:$0 sm:$0xff]  ;;  %p276_p2 = scmp.ne.s32.totalorder %s169_s12, %s275_s13  ;;  %p281_p4 = scmp.lt.s32.totalorder %s275_s13, %s275_s13 }
  0x2c   :  { %199 = vmatpush3.bf16.msra.mxu0 %v224_v2  ;;  %p282_p5 = por %p281_p4, %p280_p3 }
  0x2d   :  { %200 = vmatprep.subr.bf16.mxu0 %v307_v0 }
  0x2e   :  { %p283_p6 = pnand %p282_p5, %p276_p2 }
  0x30   :  { %201 = vmatpush3.bf16.msra.mxu0 %v225_v3 }
  0x31   :  { %202 = vmatprep.subr.bf16.mxu0 %v307_v0 }
  0x34   :  { %203 = vmatpush3.bf16.msra.mxu0 %v226_v4 }
  0x35   :  { %204 = vmatprep.subr.bf16.mxu0 %v307_v0 }
  0x38   :  { %205 = vmatpush3.bf16.msra.mxu0 %v227_v5 }
  0x39   :  { %206 = vmatprep.subr.bf16.mxu0 %v307_v0 }
  0x3c   :  { %207 = vmatpush3.bf16.msra.mxu0 %v228_v6 }
  0x3d   :  { %208 = vmatprep.subr.bf16.mxu0 %v307_v0 }
  0x40   :  { %209 = vmatpush3.bf16.msra.mxu0 %v229_v7 }
  0x41   :  { %210 = vmatprep.subr.bf16.mxu0 %v307_v0 }
  0x44   :  { %211 = vmatpush3.bf16.msra.mxu0 %v230_v8 }
  0x47   :  { %213 = vmatmul.mubr.bf16.vlgmr.msra.gmra.mrb[0].mxu0 %v55_v9 }
 0x11a   :  { %v154_v11 = vpop.f32.mrb[0].mxu0 }
 0x11b   :  { %v160_v12 = vadd.f32 %v178_v10, %v154_v11  ;;  %v214_v13 = vpop.f32.mrb[1].mxu0 }
 0x11c   :  { %v157_v14 = vpop.f32.mrb[2].mxu0 }
 0x11d   :  { %161 = vst [vmem:[#allocation7] sm:$0xff] %v160_v12  ;;  %v215_v15 = vpop.f32.mrb[3].mxu0 }
 0x11e   :  { %286 = shalt.err (!%p283_p6)
}
 0x11f   :  { %s287_s2 = scalar_lea.hbm %s379_s3, 128 }
 0x120   :  { %p288_p7 = scmp.ne.s32.totalorder %s379_s3, %s287_s2  ;;  %p291_p8 = scmp.lt.u32.totalorder %s287_s2, %s379_s3 }
 0x122   :  { %p293_p9 = pnand %p291_p8, %p288_p7 }
 0x124   :  { %296 = shalt.err (!%p293_p9)
}
 0x125   :  { %171 = dma.vmem_to_hbm [thread:$0]  %s169_s12, 128, %s379_s3, [#allocation4]  }
 0x126   :  { %301 = dma.done.wait [#allocation4], 128  }
 0x127   :  { %302 = vsyncadd [#allocation4], 4294967168 }
 0x128   :  { %175 = vsyncpa [#allocation3], 1 }
 0x129   :  { %176 = vsyncpa [#allocation6], 1 }
 0x12a   :  { %177 = vsyncpa [#allocation4], 1 }

</bundles_post_ra>
